<compile_context>
chip_gen: v7x
topology: tpu7x:2x2x1
jax: 0.10.0
libtpu: 0.0.40
codegen_flags: <defaults>
</compile_context>

<pallas_src>
import functools

import jax
import jax.numpy as jnp
from jax.experimental import pallas as pl
from jax.experimental.pallas import tpu as pltpu


def _round_up(n, m):
    return (n + m - 1) // m * m


def dqn_kernel(x_ref, w1_ref, b1_ref, w2_ref, b2_ref, w3_ref, b3_ref, o_ref, *, out_dim):
    # Cast activations to the MXU compute dtype in-kernel (x stays f32 in HBM).
    x = x_ref[...].astype(w1_ref.dtype)
    # Layer 1: (TB, D_in) @ (D_in, 128) + (1, 128) -> ReLU   (f32 accumulation)
    h1 = jnp.dot(x, w1_ref[...], preferred_element_type=jnp.float32)
    h1 = jnp.maximum(h1 + b1_ref[...], 0.0)
    # Layer 2: (TB, 128) @ (128, 128) + (1, 128) -> ReLU
    h2 = jnp.dot(h1.astype(w2_ref.dtype), w2_ref[...],
                 preferred_element_type=jnp.float32)
    h2 = jnp.maximum(h2 + b2_ref[...], 0.0)
    # Output layer: lane-dense 128-wide MXU compute, but store only the real out_dim
    # columns (narrow HBM write; padded cols are exactly zero and never leave VMEM).
    q = jnp.dot(h2.astype(w3_ref.dtype), w3_ref[...],
                preferred_element_type=jnp.float32)
    o_ref[...] = (q[:, :out_dim] + b3_ref[...]).astype(o_ref.dtype)


def prepare_dqn_params(params, compute_dtype=jnp.bfloat16):
    """Pad hidden dim (and w3's output columns) to 128 lanes and cast weights to the MXU
    compute dtype.  Zero padding is exact: padded hidden columns stay 0 through ReLU and
    padded w3 rows/cols contribute nothing.  Call once (and on target-net sync), NOT per
    forward call."""
    hidden = params["w1"].shape[1]
    out_dim = params["w3"].shape[1]
    hid_p = _round_up(max(hidden, 8), 128)
    out_p = _round_up(max(out_dim, 8), 128)
    return {
        "w1": jnp.pad(params["w1"], ((0, 0), (0, hid_p - hidden))).astype(compute_dtype),
        "b1": jnp.pad(params["b1"], ((0, 0), (0, hid_p - hidden))).astype(jnp.float32),
        "w2": jnp.pad(params["w2"], ((0, hid_p - hidden), (0, hid_p - hidden))).astype(compute_dtype),
        "b2": jnp.pad(params["b2"], ((0, 0), (0, hid_p - hidden))).astype(jnp.float32),
        "w3": jnp.pad(params["w3"], ((0, hid_p - hidden), (0, out_p - out_dim))).astype(compute_dtype),
        # b3 stays unpadded (1, out_dim): it is added after the in-kernel column slice.
        "b3": params["b3"].astype(jnp.float32),
    }


def _pick_tile(batch, tile_batch):
    """Balanced batch tile.  For batch > 64 force >= 2 tiles so the 'parallel' grid axis
    can shard across both v7x TensorCores (harmless single-loop on v5e/v6e)."""
    n_tiles = pl.cdiv(batch, tile_batch)
    if batch > 64:
        n_tiles = max(n_tiles, 2)
    return _round_up(pl.cdiv(batch, n_tiles), 8)


@functools.partial(jax.jit, static_argnames=("tile_batch",))
def dqn_forward(x, padded_params, *, tile_batch=2048):
    """DQN forward.  x: (batch, input_dim) f32.  padded_params: output of
    prepare_dqn_params()."""
    batch, in_dim = x.shape
    w1 = padded_params["w1"]
    b1 = padded_params["b1"]
    w2 = padded_params["w2"]
    b2 = padded_params["b2"]
    w3 = padded_params["w3"]
    b3 = padded_params["b3"]
    hid_p = w1.shape[1]
    out_p = w3.shape[1]
    out_dim = b3.shape[1]

    tb = _pick_tile(batch, tile_batch)
    grid = (pl.cdiv(batch, tb),)  # ragged tail tile handled by Pallas (no batch padding)

    kernel = functools.partial(dqn_kernel, out_dim=out_dim)
    return pl.pallas_call(
        kernel,
        out_shape=jax.ShapeDtypeStruct((batch, out_dim), jnp.float32),
        grid=grid,
        in_specs=[
            # x: one batch tile per grid step (auto double-buffered by the pipeline).
            pl.BlockSpec((tb, in_dim), lambda i: (i, 0)),
            # Weights / biases: constant index_map -> fetched once, VMEM-resident.
            pl.BlockSpec((in_dim, hid_p), lambda i: (0, 0)),
            pl.BlockSpec((1, hid_p), lambda i: (0, 0)),
            pl.BlockSpec((hid_p, hid_p), lambda i: (0, 0)),
            pl.BlockSpec((1, hid_p), lambda i: (0, 0)),
            pl.BlockSpec((hid_p, out_p), lambda i: (0, 0)),
            pl.BlockSpec((1, out_dim), lambda i: (0, 0)),
        ],
        # Narrow output: last dim equals the full array extent (legal), only out_dim
        # columns ever reach HBM.
        out_specs=pl.BlockSpec((tb, out_dim), lambda i: (i, 0)),
        compiler_params=pltpu.CompilerParams(
            # Independent batch tiles -> shard across both v7x TensorCores.
            dimension_semantics=("parallel",)),
    )(x, w1, b1, w2, b2, w3, b3)


def init_dqn_params(key, input_dim, output_dim, hidden=64):
    """PyTorch nn.Linear-style init (U[-1/sqrt(fan_in), 1/sqrt(fan_in)]);
    weights stored as (in_features, out_features)."""
    ks = jax.random.split(key, 6)

    def linear(kw, kb, fan_in, fan_out):
        bound = 1.0 / jnp.sqrt(fan_in)
        w = jax.random.uniform(kw, (fan_in, fan_out), jnp.float32, -bound, bound)
        b = jax.random.uniform(kb, (1, fan_out), jnp.float32, -bound, bound)
        return w, b

    w1, b1 = linear(ks[0], ks[1], input_dim, hidden)
    w2, b2 = linear(ks[2], ks[3], hidden, hidden)
    w3, b3 = linear(ks[4], ks[5], hidden, output_dim)
    return {"w1": w1, "b1": b1, "w2": w2, "b2": b2, "w3": w3, "b3": b3}


def dqn_reference(x, p):
    h1 = jnp.maximum(x @ p["w1"] + p["b1"], 0.0)
    h2 = jnp.maximum(h1 @ p["w2"] + p["b2"], 0.0)
    return h2 @ p["w3"] + p["b3"]


if __name__ == "__main__":
    key = jax.random.PRNGKey(0)
    k_x, k_x2, k_p = jax.random.split(key, 3)

    input_dim, output_dim = 16, 4
    params = init_dqn_params(k_p, input_dim, output_dim)

    # Padded / cast once, outside the jitted forward.
    params_f32 = prepare_dqn_params(params, compute_dtype=jnp.float32)
    params_bf16 = prepare_dqn_params(params, compute_dtype=jnp.bfloat16)  # default path

    # --- small batch (act() path: single tile, single grid step), exact f32 path ---
    batch = 8
    x = jax.random.normal(k_x, (batch, input_dim), jnp.float32)
    out = jax.block_until_ready(dqn_forward(x, params_f32))
    ref = dqn_reference(x, params)
    assert out.shape == (batch, output_dim), out.shape
    assert jnp.allclose(out, ref, atol=1e-5, rtol=1e-5), "small-batch f32 mismatch"

    # --- replay-buffer-sized batch, not a multiple of the tile: exercises balanced
    #     2-tile split (304 + ragged 296) with no wrapper-side batch padding ---
    big_batch = 600
    xb = jax.random.normal(k_x2, (big_batch, input_dim), jnp.float32)
    out_b = jax.block_until_ready(dqn_forward(xb, params_f32))
    ref_b = dqn_reference(xb, params)
    assert out_b.shape == (big_batch, output_dim), out_b.shape
    assert jnp.allclose(out_b, ref_b, atol=1e-5, rtol=1e-5), "big-batch f32 mismatch"

    # --- default bf16 MXU path (native on v5e/v6e/v7x); f32 accumulation + biases ---
    out_bf = jax.block_until_ready(dqn_forward(xb, params_bf16))
    assert out_bf.shape == (big_batch, output_dim), out_bf.shape
    assert jnp.allclose(out_bf, ref_b, atol=5e-2, rtol=5e-2), "bf16 mismatch"

    print("KERNEL_OK")
</pallas_src>

<mosaic_0001>
module attributes {stable_mosaic.version = 11 : i64} {
  func.func @dqn_kernel(%arg0: i32, %arg1: memref<8x16xf32, #tpu.memory_space<vmem>>, %arg2: memref<16x128xf32, #tpu.memory_space<vmem>>, %arg3: memref<1x128xf32, #tpu.memory_space<vmem>>, %arg4: memref<128x128xf32, #tpu.memory_space<vmem>>, %arg5: memref<1x128xf32, #tpu.memory_space<vmem>>, %arg6: memref<128x128xf32, #tpu.memory_space<vmem>>, %arg7: memref<1x4xf32, #tpu.memory_space<vmem>>, %arg8: memref<8x4xf32, #tpu.memory_space<vmem>>) attributes {dimension_semantics = [#tpu.dimension_semantics<parallel>], iteration_bounds = array<i64: 1>, scalar_prefetch = 0 : i64, scratch_operands = 0 : i64, tpu.core_type = #tpu.core_type<tc>, window_params = [{transform_indices = @transform_0, window_bounds = array<i64: 8, 16>}, {pipeline_mode = #tpu.pipeline_mode<synchronous>, transform_indices = @transform_1, window_bounds = array<i64: 16, 128>}, {pipeline_mode = #tpu.pipeline_mode<synchronous>, transform_indices = @transform_2, window_bounds = array<i64: 1, 128>}, {pipeline_mode = #tpu.pipeline_mode<synchronous>, transform_indices = @transform_3, window_bounds = array<i64: 128, 128>}, {pipeline_mode = #tpu.pipeline_mode<synchronous>, transform_indices = @transform_4, window_bounds = array<i64: 1, 128>}, {pipeline_mode = #tpu.pipeline_mode<synchronous>, transform_indices = @transform_5, window_bounds = array<i64: 128, 128>}, {pipeline_mode = #tpu.pipeline_mode<synchronous>, transform_indices = @transform_6, window_bounds = array<i64: 1, 4>}, {transform_indices = @transform_7, window_bounds = array<i64: 8, 4>}]} {
    %c0 = arith.constant 0 : index
    %c0_0 = arith.constant 0 : index
    %0 = vector.load %arg1[%c0, %c0_0] : memref<8x16xf32, #tpu.memory_space<vmem>>, vector<8x16xf32>
    %c0_1 = arith.constant 0 : index
    %c0_2 = arith.constant 0 : index
    %1 = vector.load %arg2[%c0_1, %c0_2] : memref<16x128xf32, #tpu.memory_space<vmem>>, vector<16x128xf32>
    %cst = arith.constant dense<0.000000e+00> : vector<8x128xf32>
    %2 = tpu.matmul %0, %1, %cst {dimension_numbers = #tpu.dot_dimension_numbers<[1], [0], [0], [1], [0, 0, 1, 1], [], []>} : vector<8x16xf32>, vector<16x128xf32>, vector<8x128xf32> -> vector<8x128xf32>
    %c0_3 = arith.constant 0 : index
    %c0_4 = arith.constant 0 : index
    %3 = vector.load %arg3[%c0_3, %c0_4] : memref<1x128xf32, #tpu.memory_space<vmem>>, vector<1x128xf32>
    %4 = vector.broadcast %3 : vector<1x128xf32> to vector<8x128xf32>
    %5 = arith.addf %2, %4 : vector<8x128xf32>
    %cst_5 = arith.constant 0.000000e+00 : f32
    %6 = vector.broadcast %cst_5 : f32 to vector<8x128xf32>
    %7 = arith.maximumf %5, %6 : vector<8x128xf32>
    %c0_6 = arith.constant 0 : index
    %c0_7 = arith.constant 0 : index
    %8 = vector.load %arg4[%c0_6, %c0_7] : memref<128x128xf32, #tpu.memory_space<vmem>>, vector<128x128xf32>
    %cst_8 = arith.constant dense<0.000000e+00> : vector<8x128xf32>
    %9 = tpu.matmul %7, %8, %cst_8 {dimension_numbers = #tpu.dot_dimension_numbers<[1], [0], [0], [1], [0, 0, 1, 1], [], []>} : vector<8x128xf32>, vector<128x128xf32>, vector<8x128xf32> -> vector<8x128xf32>
    %c0_9 = arith.constant 0 : index
    %c0_10 = arith.constant 0 : index
    %10 = vector.load %arg5[%c0_9, %c0_10] : memref<1x128xf32, #tpu.memory_space<vmem>>, vector<1x128xf32>
    %11 = vector.broadcast %10 : vector<1x128xf32> to vector<8x128xf32>
    %12 = arith.addf %9, %11 : vector<8x128xf32>
    %cst_11 = arith.constant 0.000000e+00 : f32
    %13 = vector.broadcast %cst_11 : f32 to vector<8x128xf32>
    %14 = arith.maximumf %12, %13 : vector<8x128xf32>
    %c0_12 = arith.constant 0 : index
    %c0_13 = arith.constant 0 : index
    %15 = vector.load %arg6[%c0_12, %c0_13] : memref<128x128xf32, #tpu.memory_space<vmem>>, vector<128x128xf32>
    %cst_14 = arith.constant dense<0.000000e+00> : vector<8x128xf32>
    %16 = tpu.matmul %14, %15, %cst_14 {dimension_numbers = #tpu.dot_dimension_numbers<[1], [0], [0], [1], [0, 0, 1, 1], [], []>} : vector<8x128xf32>, vector<128x128xf32>, vector<8x128xf32> -> vector<8x128xf32>
    %17 = vector.extract_strided_slice %16 {offsets = [0, 0], sizes = [8, 4], strides = [1, 1]} : vector<8x128xf32> to vector<8x4xf32>
    %c0_15 = arith.constant 0 : index
    %c0_16 = arith.constant 0 : index
    %18 = vector.load %arg7[%c0_15, %c0_16] : memref<1x4xf32, #tpu.memory_space<vmem>>, vector<1x4xf32>
    %19 = vector.broadcast %18 : vector<1x4xf32> to vector<8x4xf32>
    %20 = arith.addf %17, %19 : vector<8x4xf32>
    %c0_17 = arith.constant 0 : index
    %c0_18 = arith.constant 0 : index
    %21 = vector.load %arg8[%c0_17, %c0_18] : memref<8x4xf32, #tpu.memory_space<vmem>>, vector<8x4xf32>
    tpu.vector_store %arg8[%c0_17, %c0_18], %20 {strides = array<i32>} : memref<8x4xf32, #tpu.memory_space<vmem>>, vector<8x4xf32>,
    return
  }
  func.func @transform_0(%arg0: i32) -> (i32, i32) {
    %c0_i32 = arith.constant 0 : i32
    %c0_i32_0 = arith.constant 0 : i32
    return %arg0, %c0_i32 : i32, i32
  }
  func.func @transform_1(%arg0: i32) -> (i32, i32) {
    %c0_i32 = arith.constant 0 : i32
    %c0_i32_0 = arith.constant 0 : i32
    %c0_i32_1 = arith.constant 0 : i32
    return %c0_i32, %c0_i32_0 : i32, i32
  }
  func.func @transform_2(%arg0: i32) -> (i32, i32) {
    %c0_i32 = arith.constant 0 : i32
    %c0_i32_0 = arith.constant 0 : i32
    %c0_i32_1 = arith.constant 0 : i32
    return %c0_i32, %c0_i32_0 : i32, i32
  }
  func.func @transform_3(%arg0: i32) -> (i32, i32) {
    %c0_i32 = arith.constant 0 : i32
    %c0_i32_0 = arith.constant 0 : i32
    %c0_i32_1 = arith.constant 0 : i32
    return %c0_i32, %c0_i32_0 : i32, i32
  }
  func.func @transform_4(%arg0: i32) -> (i32, i32) {
    %c0_i32 = arith.constant 0 : i32
    %c0_i32_0 = arith.constant 0 : i32
    %c0_i32_1 = arith.constant 0 : i32
    return %c0_i32, %c0_i32_0 : i32, i32
  }
  func.func @transform_5(%arg0: i32) -> (i32, i32) {
    %c0_i32 = arith.constant 0 : i32
    %c0_i32_0 = arith.constant 0 : i32
    %c0_i32_1 = arith.constant 0 : i32
    return %c0_i32, %c0_i32_0 : i32, i32
  }
  func.func @transform_6(%arg0: i32) -> (i32, i32) {
    %c0_i32 = arith.constant 0 : i32
    %c0_i32_0 = arith.constant 0 : i32
    %c0_i32_1 = arith.constant 0 : i32
    return %c0_i32, %c0_i32_0 : i32, i32
  }
  func.func @transform_7(%arg0: i32) -> (i32, i32) {
    %c0_i32 = arith.constant 0 : i32
    %c0_i32_0 = arith.constant 0 : i32
    return %arg0, %c0_i32 : i32, i32
  }
}

</mosaic_0001>

<bundles_post_ra>
// kernel: dqn_forward.1
= control target key start
LH: loop header
LB: loop body
LE: loop exit
PB: predicated region body
PF: predicated region fallthrough
CT: control target
= control target key end

     0   :  { %12 = vsyncpa [#allocation3], 0  ;;  %s771_s0 = inlined_call_operand.hbm [shape: f32[8,16], index: 0, kind: input, shape index: {}]   ;;  %s772_s1 = inlined_call_operand.hbm [shape: f32[16,128], index: 1, kind: input, shape index: {}]   ;;  %s773_s2 = inlined_call_operand.vmem [shape: f32[1,128], index: 2, kind: input, shape index: {}]   ;;  %s774_s3 = inlined_call_operand.hbm [shape: f32[128,128], index: 3, kind: input, shape index: {}]   ;;  %s775_s4 = inlined_call_operand.vmem [shape: f32[1,128], index: 4, kind: input, shape index: {}]   ;;  %s776_s5 = inlined_call_operand.hbm [shape: f32[128,128], index: 5, kind: input, shape index: {}]   ;;  %s777_s6 = inlined_call_operand.vmem [shape: f32[1,4], index: 6, kind: input, shape index: {}]   ;;  %s778_s7 = inlined_call_operand.vmem [shape: f32[8,4], index: 7, kind: output, shape index: {}]  }
   0x1   :  { %13 = vsyncpa [#allocation5], 0 }
   0x2   :  { %14 = vsyncpa [#allocation8], 0  ;;  %s633_s24 = smov [#allocation4]   ;;  %s539_s28 = scalar_lea.hbm %s772_s1, 256 }
   0x3   :  { %s30_s25 = sshll.u32 %s633_s24, 4  ;;  %p540_p0 = scmp.ne.s32.totalorder %s772_s1, %s539_s28  ;;  %s31_s25 = int_to_ptr.vmem [resolvable:$true] %s30_s25 }
   0x4   :  { %p543_p1 = scmp.lt.u32.totalorder %s539_s28, %s772_s1 }
   0x6   :  { %p545_p2 = pnand %p543_p1, %p540_p0 }
   0x8   :  { %548 = shalt.err (!%p545_p2)
}
   0x9   :  { %s549_s10 = scalar_lea.vmem %s31_s25, 256  ;;  %p554_p4 = scmp.lt.s32.totalorder %s31_s25, %s31_s25 }
   0xa   :  { %p550_p3 = scmp.ne.s32.totalorder %s31_s25, %s549_s10  ;;  %p555_p5 = scmp.lt.s32.totalorder %s549_s10, %s549_s10 }
   0xc   :  { %p556_p6 = por %p555_p5, %p554_p4 }
   0xe   :  { %p557_p7 = pnand %p556_p6, %p550_p3 }
  0x10   :  { %560 = shalt.err (!%p557_p7)
}
  0x11   :  { %s634_s11 = smov 128   ;;  %s635_s12 = smov 8  }
  0x12   :  { %36 = dma.hbm_to_vmem [thread:$0]  %s772_s1, 256, %s31_s25, [#allocation5], %s634_s11, %s634_s11, %s635_s12  }
  0x13   :  { %s636_s15 = smov [#allocation2]   ;;  %s637_s17 = smov [#allocation6]  }
  0x14   :  { %s21_s16 = sshll.u32 %s636_s15, 4  ;;  %s44_s18 = sshll.u32 %s637_s17, 4  ;;  %s22_s16 = int_to_ptr.vmem [resolvable:$true] %s21_s16  ;;  %s45_s18 = int_to_ptr.vmem [resolvable:$true] %s44_s18 }
  0x15   :  { %s561_s21 = scalar_lea.hbm %s771_s0, 128 }
  0x16   :  { %p562_p8 = scmp.ne.s32.totalorder %s771_s0, %s561_s21  ;;  %p565_p9 = scmp.lt.u32.totalorder %s561_s21, %s771_s0 }
  0x18   :  { %p567_p10 = pnand %p565_p9, %p562_p8 }
  0x1a   :  { %570 = shalt.err (!%p567_p10)
}
  0x1b   :  { %s571_s1 = scalar_lea.vmem %s22_s16, 128  ;;  %p576_p12 = scmp.lt.s32.totalorder %s22_s16, %s22_s16 }
  0x1c   :  { %p572_p11 = scmp.ne.s32.totalorder %s22_s16, %s571_s1  ;;  %p577_p13 = scmp.lt.s32.totalorder %s571_s1, %s571_s1 }
  0x1e   :  { %p578_p0 = por %p577_p13, %p576_p12 }
  0x20   :  { %p579_p1 = pnand %p578_p0, %p572_p11 }
  0x22   :  { %582 = shalt.err (!%p579_p1)
}
  0x23   :  { %24 = dma.hbm_to_vmem [thread:$0]  %s771_s0, 128, %s22_s16, [#allocation3]  }
  0x24   :  { %s583_s30 = scalar_lea.hbm %s774_s3, 2048 }
  0x25   :  { %p584_p2 = scmp.ne.s32.totalorder %s774_s3, %s583_s30  ;;  %p587_p3 = scmp.lt.u32.totalorder %s583_s30, %s774_s3 }
  0x27   :  { %p589_p4 = pnand %p587_p3, %p584_p2 }
  0x29   :  { %592 = shalt.err (!%p589_p4)
}
  0x2a   :  { %s593_s14 = scalar_lea.vmem %s45_s18, 2048  ;;  %p598_p6 = scmp.lt.s32.totalorder %s45_s18, %s45_s18 }
  0x2b   :  { %p594_p5 = scmp.ne.s32.totalorder %s45_s18, %s593_s14  ;;  %p599_p7 = scmp.lt.s32.totalorder %s593_s14, %s593_s14 }
  0x2d   :  { %p600_p8 = por %p599_p7, %p598_p6 }
  0x2f   :  { %p601_p9 = pnand %p600_p8, %p594_p5 }
  0x31   :  { %604 = shalt.err (!%p601_p9)
}
  0x32   :  { %50 = dma.hbm_to_vmem [thread:$0]  %s774_s3, 2048, %s45_s18, [#allocation5], %s634_s11, %s634_s11, %s635_s12  }
  0x33   :  { %s638_s16 = smov [#allocation7]   ;;  %s605_s21 = scalar_lea.hbm %s776_s5, 2048 }
  0x34   :  { %s58_s17 = sshll.u32 %s638_s16, 4  ;;  %p606_p10 = scmp.ne.s32.totalorder %s776_s5, %s605_s21  ;;  %s59_s17 = int_to_ptr.vmem [resolvable:$true] %s58_s17 }
  0x35   :  { %p609_p11 = scmp.lt.u32.totalorder %s605_s21, %s776_s5 }
  0x37   :  { %p611_p12 = pnand %p609_p11, %p606_p10 }
  0x39   :  { %614 = shalt.err (!%p611_p12)
}
  0x3a   :  { %s615_s1 = scalar_lea.vmem %s59_s17, 2048  ;;  %p620_p0 = scmp.lt.s32.totalorder %s59_s17, %s59_s17 }
  0x3b   :  { %p616_p13 = scmp.ne.s32.totalorder %s59_s17, %s615_s1  ;;  %p621_p1 = scmp.lt.s32.totalorder %s615_s1, %s615_s1 }
  0x3d   :  { %p622_p2 = por %p621_p1, %p620_p0 }
  0x3f   :  { %p623_p3 = pnand %p622_p2, %p616_p13 }
  0x41   :  { %626 = shalt.err (!%p623_p3)
}
  0x42   :  { %64 = dma.hbm_to_vmem [thread:$0]  %s776_s5, 2048, %s59_s17, [#allocation8], %s634_s11, %s634_s11, %s635_s12  }
  0x43   :  { %627 = dma.done.wait [#allocation3], 128  }
  0x44   :  { %628 = vsyncadd [#allocation3], 4294967168 }
  0x45   :  { %629 = dma.done.wait [#allocation5], 2304  }
  0x46   :  { %630 = vsyncadd [#allocation5], 4294964992 }
  0x47   :  { %631 = dma.done.wait [#allocation8], 2048  }
  0x48   :  { %632 = vsyncadd [#allocation8], 4294965248  ;;  %v639_v0 = vmov 0.0|0.0   ;;  %vm640_vm0 = vmmov 0   ;;  %v641_v1 = vmov 0.0   ;;  %v80_v2 = vld [vmem:[#allocation4] sm:$0xff] }
  0x49   :  { %479 = vmatprep.subr.bf16.mxu0 %v639_v0  ;;  %406 = vmatprep.mubr.msk.f32.mxu0 %vm640_vm0, %v641_v1  ;;  %v81_v3 = vld [vmem:[#allocation4 + $0x8] sm:$0xff]  ;;  %v164_v5 = vld [vmem:[#allocation6] sm:$0xff]  ;;  %v165_v6 = vld [vmem:[#allocation6 + $0x8] sm:$0xff]  ;;  %vm89_vm1 = vcmask 130048   ;;  %vm352_vm2 = vcmask 31744  }
  0x4a   :  { %482 = vmatprep.subr.bf16.mxu1 %v639_v0  ;;  %441 = vmatprep.mubr.msk.f32.mxu1 %vm640_vm0, %v641_v1  ;;  %v480_v4 = vpack.c.bf16 %v81_v3, %v80_v2  ;;  %v166_v7 = vld [vmem:[#allocation6 + $0x10] sm:$0xff]  ;;  %v483_v8 = vpack.c.bf16 %v165_v6, %v164_v5  ;;  %v167_v9 = vld [vmem:[#allocation6 + $0x18] sm:$0xff]  ;;  %v79_v10 = vld [vmem:[#allocation2] sm:$0xff] }
  0x4b   :  { %v486_v11 = vpack.c.bf16 %v167_v9, %v166_v7  ;;  %v168_v12 = vld [vmem:[#allocation6 + $0x20] sm:$0xff]  ;;  %v169_v13 = vld [vmem:[#allocation6 + $0x28] sm:$0xff]  ;;  %v170_v15 = vld [vmem:[#allocation6 + $0x30] sm:$0xff] }
  0x4c   :  { %481 = vmatpush3.bf16.msra.mxu0 %v480_v4  ;;  %484 = vmatpush3.bf16.msra.mxu1 %v483_v8  ;;  %v489_v14 = vpack.c.bf16 %v169_v13, %v168_v12  ;;  %v171_v16 = vld [vmem:[#allocation6 + $0x38] sm:$0xff]  ;;  %v172_v18 = vld [vmem:[#allocation6 + $0x40] sm:$0xff]  ;;  %v173_v19 = vld [vmem:[#allocation6 + $0x48] sm:$0xff] }
  0x4d   :  { %506 = vmatprep.subr.bf16.mxu0 %v639_v0  ;;  %485 = vmatprep.subr.bf16.mxu1 %v639_v0  ;;  %v492_v17 = vpack.c.bf16 %v171_v16, %v170_v15  ;;  %v495_v20 = vpack.c.bf16 %v173_v19, %v172_v18  ;;  %v174_v21 = vld [vmem:[#allocation6 + $0x50] sm:$0xff]  ;;  %v175_v22 = vld [vmem:[#allocation6 + $0x58] sm:$0xff]  ;;  %v176_v24 = vld [vmem:[#allocation6 + $0x60] sm:$0xff] }
  0x4e   :  { %v498_v23 = vpack.c.bf16 %v175_v22, %v174_v21  ;;  %v177_v25 = vld [vmem:[#allocation6 + $0x68] sm:$0xff]  ;;  %v178_v27 = vld [vmem:[#allocation6 + $0x70] sm:$0xff]  ;;  %v179_v28 = vld [vmem:[#allocation6 + $0x78] sm:$0xff] }
  0x4f   :  { %407 = vmatmul.mubr.msk.f32.vlgmr.msra.gmra.mrb[0].mxu0 %vm89_vm1, %v79_v10  ;;  %v501_v26 = vpack.c.bf16 %v177_v25, %v176_v24  ;;  %v504_v29 = vpack.c.bf16 %v179_v28, %v178_v27  ;;  %v258_v30 = vld [vmem:[#allocation7] sm:$0xff]  ;;  %v259_v31 = vld [vmem:[#allocation7 + $0x8] sm:$0xff]  ;;  %v260_v32 = vld [vmem:[#allocation7 + $0x10] sm:$0xff] }
  0x50   :  { %476 = vmatprep.mubr.msk.f32.mxu0 %vm640_vm0, %v641_v1  ;;  %487 = vmatpush3.bf16.msra.mxu1 %v486_v11  ;;  %v507_v33 = vpack.c.bf16 %v259_v31, %v258_v30  ;;  %v261_v34 = vld [vmem:[#allocation7 + $0x18] sm:$0xff]  ;;  %v262_v36 = vld [vmem:[#allocation7 + $0x20] sm:$0xff]  ;;  %v263_v37 = vld [vmem:[#allocation7 + $0x28] sm:$0xff] }
  0x51   :  { %488 = vmatprep.subr.bf16.mxu1 %v639_v0  ;;  %v510_v35 = vpack.c.bf16 %v261_v34, %v260_v32  ;;  %v513_v38 = vpack.c.bf16 %v263_v37, %v262_v36  ;;  %v264_v39 = vld [vmem:[#allocation7 + $0x30] sm:$0xff]  ;;  %v265_v40 = vld [vmem:[#allocation7 + $0x38] sm:$0xff]  ;;  %v266_v42 = vld [vmem:[#allocation7 + $0x40] sm:$0xff] }
  0x52   :  { %508 = vmatpush3.bf16.msra.mxu0 %v507_v33  ;;  %v516_v41 = vpack.c.bf16 %v265_v40, %v264_v39  ;;  %v267_v43 = vld [vmem:[#allocation7 + $0x48] sm:$0xff]  ;;  %v268_v45 = vld [vmem:[#allocation7 + $0x50] sm:$0xff]  ;;  %v269_v46 = vld [vmem:[#allocation7 + $0x58] sm:$0xff] }
  0x53   :  { %509 = vmatprep.subr.bf16.mxu0 %v639_v0  ;;  %v519_v44 = vpack.c.bf16 %v267_v43, %v266_v42  ;;  %v522_v47 = vpack.c.bf16 %v269_v46, %v268_v45  ;;  %v270_v48 = vld [vmem:[#allocation7 + $0x60] sm:$0xff]  ;;  %v271_v49 = vld [vmem:[#allocation7 + $0x68] sm:$0xff]  ;;  %v272_v56 = vld [vmem:[#allocation7 + $0x70] sm:$0xff] }
  0x54   :  { %490 = vmatpush3.bf16.msra.mxu1 %v489_v14  ;;  %v525_v50 = vpack.c.bf16 %v271_v49, %v270_v48  ;;  %v361_v51 = vld [vmem:[%s773_s2] ss:$0 sm:$0xff]  ;;  %v273_v57 = vld [vmem:[#allocation7 + $0x78] sm:$0xff] }
  0x55   :  { %491 = vmatprep.subr.bf16.mxu1 %v639_v0  ;;  %v528_v58 = vpack.c.bf16 %v273_v57, %v272_v56  ;;  %v363_v59 = vld [vmem:[%s775_s4] ss:$0 sm:$0xff] }
  0x56   :  { %511 = vmatpush3.bf16.msra.mxu0 %v510_v35 }
  0x57   :  { %512 = vmatprep.subr.bf16.mxu0 %v639_v0 }
  0x58   :  { %493 = vmatpush3.bf16.msra.mxu1 %v492_v17 }
  0x59   :  { %494 = vmatprep.subr.bf16.mxu1 %v639_v0 }
  0x5a   :  { %514 = vmatpush3.bf16.msra.mxu0 %v513_v38 }
  0x5b   :  { %515 = vmatprep.subr.bf16.mxu0 %v639_v0 }
  0x5c   :  { %496 = vmatpush3.bf16.msra.mxu1 %v495_v20 }
  0x5d   :  { %497 = vmatprep.subr.bf16.mxu1 %v639_v0 }
  0x5e   :  { %517 = vmatpush3.bf16.msra.mxu0 %v516_v41 }
  0x5f   :  { %518 = vmatprep.subr.bf16.mxu0 %v639_v0 }
  0x60   :  { %499 = vmatpush3.bf16.msra.mxu1 %v498_v23 }
  0x61   :  { %500 = vmatprep.subr.bf16.mxu1 %v639_v0 }
  0x62   :  { %520 = vmatpush3.bf16.msra.mxu0 %v519_v44 }
  0x63   :  { %521 = vmatprep.subr.bf16.mxu0 %v639_v0 }
  0x64   :  { %502 = vmatpush3.bf16.msra.mxu1 %v501_v26 }
  0x65   :  { %503 = vmatprep.subr.bf16.mxu1 %v639_v0 }
  0x66   :  { %523 = vmatpush3.bf16.msra.mxu0 %v522_v47 }
  0x67   :  { %524 = vmatprep.subr.bf16.mxu0 %v639_v0 }
  0x68   :  { %505 = vmatpush3.bf16.msra.mxu1 %v504_v29 }
  0x6a   :  { %526 = vmatpush3.bf16.msra.mxu0 %v525_v50 }
  0x6b   :  { %527 = vmatprep.subr.bf16.mxu0 %v639_v0  ;;  %v364_v0 = vld [vmem:[%s777_s6] ss:$0 sm:$0xff] }
  0x6e   :  { %529 = vmatpush3.bf16.msra.mxu0 %v528_v58 }
 0x122   :  { %v159_v52 = vpop.f32.mrb[0].mxu0 }
 0x123   :  { %v160_v53 = vadd.f32 %v361_v51, %v159_v52  ;;  %v408_v54 = vpop.f32.mrb[1].mxu0 }
 0x125   :  { %v163_v55 = vmax.f32 %v160_v53, 0.0 }
 0x127   :  { %442 = vmatmul.mubr.f32.vlgmr.msra.gmra.mrb[0].mxu1 %v163_v55 }
 0x1fa   :  { %v253_v60 = vpop.f32.mrb[0].mxu1 }
 0x1fb   :  { %v254_v61 = vadd.f32 %v363_v59, %v253_v60  ;;  %v443_v62 = vpop.f32.mrb[1].mxu1 }
 0x1fd   :  { %v257_v63 = vmax.f32 %v254_v61, 0.0 }
 0x1ff   :  { %477 = vmatmul.mubr.f32.vlgmr.msra.gmra.mrb[2].mxu0 %v257_v63 }
 0x2d2   :  { %v340_v1 = vpop.f32.mrb[2].mxu0 }
 0x2d3   :  { %v351_v2 = vadd.f32 %v364_v0, %v340_v1  ;;  %v478_v3 = vpop.f32.mrb[3].mxu0 }
 0x2d5   :  { %353 = vst.msk [vmem:[%s778_s7] sm:$0xff] %vm352_vm2, %v351_v2 }
 0x2d6   :  { %358 = vsyncpa [#allocation3], 1 }
 0x2d7   :  { %359 = vsyncpa [#allocation5], 1 }
 0x2d8   :  { %360 = vsyncpa [#allocation8], 1 }

</bundles_post_ra>
